<compile_context>
chip_gen: v7x
topology: tpu7x:2x2x1
jax: 0.10.0
libtpu: 0.0.40
codegen_flags: <defaults>
</compile_context>

<pallas_src>
import jax
import jax.numpy as jnp
from jax import lax
from jax.experimental import pallas as pl
from jax.experimental.pallas import tpu as pltpu

BN_EPS = 1e-5
H1 = 1024
H2 = 128


def classifier_kernel(site_ref, colsite_ref, x_ref, w1_ref, b1_ref,
                      w2_ref, b2_ref, w3_ref, b3_ref, out_ref):
    wdt = w1_ref.dtype
    x = x_ref[...]                                             # [TB, F] (weight dtype)

    # fc1 + relu   (dropout = identity in eval mode)
    h1 = jnp.dot(x, w1_ref[...], preferred_element_type=jnp.float32) + b1_ref[...]
    h1 = jnp.maximum(h1, 0.0)

    # fc2 (eval-mode BatchNorm folded in -- exact affine) + relu
    h2 = jnp.dot(h1.astype(wdt), w2_ref[...],
                 preferred_element_type=jnp.float32) + b2_ref[...]
    h2 = jnp.maximum(h2, 0.0)

    # fc3 (output columns zero-padded to a lane-dense multiple of 128)
    logits = jnp.dot(h2.astype(wdt), w3_ref[...],
                     preferred_element_type=jnp.float32) + b3_ref[...]

    # Per-sample site mask as a single select. colsite_ref is a precomputed
    # [1, O_pad] column->site-id table (-1 for padded columns, never matches).
    site = site_ref[...]                                       # [TB, 1] int32
    out_ref[...] = jnp.where(colsite_ref[...] == site, logits,
                             -jnp.inf).astype(out_ref.dtype)


def make_params(key, feature_vector, num_classes, num_sites):
    ks = jax.random.split(key, 8)
    p = {}
    p["w1"] = (jax.random.normal(ks[0], (feature_vector, H1), jnp.float32)
               * (1.0 / jnp.sqrt(feature_vector)))
    p["b1"] = jax.random.normal(ks[1], (1, H1), jnp.float32) * 0.01
    p["w2"] = (jax.random.normal(ks[2], (H1, H2), jnp.float32)
               * (1.0 / jnp.sqrt(float(H1))))
    p["b2"] = jax.random.normal(ks[3], (1, H2), jnp.float32) * 0.01
    p["gamma"] = jnp.ones((1, H2), jnp.float32) * 1.1
    p["beta"] = jnp.ones((1, H2), jnp.float32) * 0.05
    p["rmean"] = jax.random.normal(ks[6], (1, H2), jnp.float32) * 0.1
    p["rvar"] = jnp.ones((1, H2), jnp.float32) * 0.9
    out_dim = num_classes * num_sites
    p["w3"] = (jax.random.normal(ks[4], (H2, out_dim), jnp.float32)
               * (1.0 / jnp.sqrt(float(H2))))
    p["b3"] = jax.random.normal(ks[5], (1, out_dim), jnp.float32) * 0.01
    return p


def classifier_forward(x, site, params, num_classes, num_sites,
                       block_b=512, weight_dtype=jnp.bfloat16,
                       out_dtype=jnp.float32):
    B, F = x.shape
    out_dim = num_classes * num_sites
    out_pad = ((out_dim + 127) // 128) * 128          # lane-dense classifier width
    wdt = jnp.dtype(weight_dtype)

    # ---- Fold eval-mode BatchNorm1d into fc2 (exact affine rewrite). ----
    scale = params["gamma"] * lax.rsqrt(params["rvar"] + BN_EPS)      # [1, H2]
    w2f = params["w2"] * scale
    b2f = (params["b2"] - params["rmean"]) * scale + params["beta"]

    w1 = params["w1"].astype(wdt)
    w2 = w2f.astype(wdt)
    w3 = params["w3"]
    b3 = params["b3"]
    if out_pad != out_dim:
        w3 = jnp.pad(w3, ((0, 0), (0, out_pad - out_dim)))
        b3 = jnp.pad(b3, ((0, 0), (0, out_pad - out_dim)))
    w3 = w3.astype(wdt)
    b1 = params["b1"].astype(jnp.float32)
    b2 = b2f.astype(jnp.float32)
    b3 = b3.astype(jnp.float32)

    # Column -> site-id table (hoisted integer divide; -1 marks pad columns).
    cols = jnp.arange(out_pad, dtype=jnp.int32)
    col_site = jnp.where(cols < out_dim, cols // num_classes,
                         -1).reshape(1, out_pad).astype(jnp.int32)

    # ---- Batch tile: sublane-granular for the chosen dtype (8 f32 / 16 bf16). ----
    gran = max(8, 32 // wdt.itemsize)
    tb = min(int(block_b), pl.cdiv(B, gran) * gran)
    tb = max(gran, (tb // gran) * gran)
    pad_b = pl.cdiv(B, tb) * tb
    if pad_b != B:                                     # ragged tail: pad, slice later
        x = jnp.pad(x, ((0, pad_b - B), (0, 0)))
        site = jnp.pad(site, (0, pad_b - B))
    x = x.astype(wdt)                                  # host-side cast, halves x DMA
    site2d = site.reshape(pad_b, 1).astype(jnp.int32)
    grid = (pad_b // tb,)

    # ---- VMEM budget: weights counted 2x (pipeline may double-buffer constant
    #      blocks), IO tiles 2x, lane-padded site tile, live intermediates. ----
    out_isz = jnp.dtype(out_dtype).itemsize
    wbytes = 2 * ((w1.size + w2.size + w3.size) * wdt.itemsize
                  + (b1.size + b2.size + b3.size + col_site.size) * 4)
    io_bytes = 2 * (tb * F * wdt.itemsize + tb * out_pad * out_isz
                    + tb * 128 * 4)                    # (tb,1) site pads to 128 lanes
    act_bytes = 2 * tb * (H1 + H2 + out_pad) * 4
    need = wbytes + io_bytes + act_bytes + (4 << 20)
    try:
        cap = int(pltpu.get_tpu_info().vmem_capacity_bytes)  # 64 MiB v7x, 128 MiB v5e/v6e
    except Exception:
        cap = 64 << 20
    vmem_limit = max(32 << 20, min(need, cap - (8 << 20)))

    resident = lambda shape: pl.BlockSpec(shape, lambda i: (0, 0))
    out = pl.pallas_call(
        classifier_kernel,
        out_shape=jax.ShapeDtypeStruct((pad_b, out_pad), out_dtype),
        grid=grid,
        in_specs=[
            pl.BlockSpec((tb, 1), lambda i: (i, 0)),   # site
            resident((1, out_pad)),                    # column -> site table
            pl.BlockSpec((tb, F), lambda i: (i, 0)),   # x
            resident((F, H1)),                         # w1
            resident((1, H1)),                         # b1
            resident((H1, H2)),                        # w2 (BN folded)
            resident((1, H2)),                         # b2 (BN folded)
            resident((H2, out_pad)),                   # w3 (lane padded)
            resident((1, out_pad)),                    # b3 (lane padded)
        ],
        out_specs=pl.BlockSpec((tb, out_pad), lambda i: (i, 0)),
        compiler_params=pltpu.CompilerParams(
            dimension_semantics=("parallel",),
            vmem_limit_bytes=int(vmem_limit)),
    )(site2d, col_site, x, w1, b1, w2, b2, w3, b3)

    return out[:B, :out_dim]


# ---------------------------- references ----------------------------

def _apply_site_mask(logits, site, num_classes, num_sites):
    B = logits.shape[0]
    logits3 = logits.reshape(B, num_sites, num_classes)
    onehot = (jnp.arange(num_sites)[None, :] == site[:, None])
    mask = jnp.where(onehot[:, :, None], 0.0, -jnp.inf)
    return (logits3 + mask).reshape(B, num_sites * num_classes)


def reference_forward(x, site, params, num_classes, num_sites):
    """PyTorch-faithful f32 eval-mode forward (BN running stats, dropout=id)."""
    h1 = jnp.maximum(x @ params["w1"] + params["b1"], 0.0)
    h2 = h1 @ params["w2"] + params["b2"]
    h2 = ((h2 - params["rmean"]) / jnp.sqrt(params["rvar"] + BN_EPS)
          * params["gamma"] + params["beta"])
    h2 = jnp.maximum(h2, 0.0)
    logits = h2 @ params["w3"] + params["b3"]
    return _apply_site_mask(logits, site, num_classes, num_sites)


def reference_forward_quant(x, site, params, num_classes, num_sites, wdt):
    """Mirrors kernel's BN fold + low-precision storage with f32 accumulation."""
    scale = params["gamma"] * lax.rsqrt(params["rvar"] + BN_EPS)
    w1 = params["w1"].astype(wdt)
    w2 = (params["w2"] * scale).astype(wdt)
    b2 = (params["b2"] - params["rmean"]) * scale + params["beta"]
    w3 = params["w3"].astype(wdt)
    h1 = jnp.maximum(jnp.dot(x.astype(wdt), w1,
                             preferred_element_type=jnp.float32) + params["b1"], 0.0)
    h2 = jnp.maximum(jnp.dot(h1.astype(wdt), w2,
                             preferred_element_type=jnp.float32) + b2, 0.0)
    logits = jnp.dot(h2.astype(wdt), w3,
                     preferred_element_type=jnp.float32) + params["b3"]
    return _apply_site_mask(logits, site, num_classes, num_sites)


if __name__ == "__main__":
    key = jax.random.PRNGKey(0)
    B = 20                 # not a multiple of the batch tile -> exercises padding
    feature_vector = 32
    num_classes = 3
    num_sites = 5

    kx, ks, kp = jax.random.split(key, 3)
    x = jax.random.normal(kx, (B, feature_vector), jnp.float32)
    site = jax.random.randint(ks, (B,), 0, num_sites, jnp.int32)
    params = make_params(kp, feature_vector, num_classes, num_sites)

    def check(out, ref, atol, rtol):
        assert out.shape == ref.shape
        finite = jnp.isfinite(ref)
        assert bool(jnp.all(jnp.isfinite(out) == finite))
        assert bool(jnp.allclose(jnp.where(finite, out, 0.0),
                                 jnp.where(finite, ref, 0.0),
                                 atol=atol, rtol=rtol))

    # f32 path: bit-tight check vs the PyTorch-faithful reference (3-step grid).
    out_f32 = classifier_forward(x, site, params, num_classes, num_sites,
                                 block_b=8, weight_dtype=jnp.float32)
    out_f32 = jax.block_until_ready(out_f32)
    check(out_f32, reference_forward(x, site, params, num_classes, num_sites),
          atol=1e-4, rtol=1e-4)

    # Default bf16-weight path (f32 MXU accumulation): checked against the
    # bf16-quantized reference with matching BN fold.
    out_bf16 = classifier_forward(x, site, params, num_classes, num_sites,
                                  block_b=16)
    out_bf16 = jax.block_until_ready(out_bf16)
    check(out_bf16,
          reference_forward_quant(x, site, params, num_classes, num_sites,
                                  jnp.bfloat16),
          atol=2e-2, rtol=2e-2)

    print("KERNEL_OK")
</pallas_src>

<mosaic_0001>
module attributes {stable_mosaic.version = 11 : i64} {
  func.func @classifier_kernel(%arg0: i32, %arg1: memref<8x1xi32, #tpu.memory_space<vmem>>, %arg2: memref<1x128xi32, #tpu.memory_space<vmem>>, %arg3: memref<8x32xf32, #tpu.memory_space<vmem>>, %arg4: memref<32x1024xf32, #tpu.memory_space<vmem>>, %arg5: memref<1x1024xf32, #tpu.memory_space<vmem>>, %arg6: memref<1024x128xf32, #tpu.memory_space<vmem>>, %arg7: memref<1x128xf32, #tpu.memory_space<vmem>>, %arg8: memref<128x128xf32, #tpu.memory_space<vmem>>, %arg9: memref<1x128xf32, #tpu.memory_space<vmem>>, %arg10: memref<8x128xf32, #tpu.memory_space<vmem>>) attributes {dimension_semantics = [#tpu.dimension_semantics<parallel>], iteration_bounds = array<i64: 3>, scalar_prefetch = 0 : i64, scratch_operands = 0 : i64, tpu.core_type = #tpu.core_type<tc>, window_params = [{transform_indices = @transform_0, window_bounds = array<i64: 8, 1>}, {pipeline_mode = #tpu.pipeline_mode<synchronous>, transform_indices = @transform_1, window_bounds = array<i64: 1, 128>}, {transform_indices = @transform_2, window_bounds = array<i64: 8, 32>}, {pipeline_mode = #tpu.pipeline_mode<synchronous>, transform_indices = @transform_3, window_bounds = array<i64: 32, 1024>}, {pipeline_mode = #tpu.pipeline_mode<synchronous>, transform_indices = @transform_4, window_bounds = array<i64: 1, 1024>}, {pipeline_mode = #tpu.pipeline_mode<synchronous>, transform_indices = @transform_5, window_bounds = array<i64: 1024, 128>}, {pipeline_mode = #tpu.pipeline_mode<synchronous>, transform_indices = @transform_6, window_bounds = array<i64: 1, 128>}, {pipeline_mode = #tpu.pipeline_mode<synchronous>, transform_indices = @transform_7, window_bounds = array<i64: 128, 128>}, {pipeline_mode = #tpu.pipeline_mode<synchronous>, transform_indices = @transform_8, window_bounds = array<i64: 1, 128>}, {transform_indices = @transform_9, window_bounds = array<i64: 8, 128>}]} {
    %c0 = arith.constant 0 : index
    %c0_0 = arith.constant 0 : index
    %0 = vector.load %arg3[%c0, %c0_0] : memref<8x32xf32, #tpu.memory_space<vmem>>, vector<8x32xf32>
    %c0_1 = arith.constant 0 : index
    %c0_2 = arith.constant 0 : index
    %1 = vector.load %arg4[%c0_1, %c0_2] : memref<32x1024xf32, #tpu.memory_space<vmem>>, vector<32x1024xf32>
    %cst = arith.constant dense<0.000000e+00> : vector<8x1024xf32>
    %2 = tpu.matmul %0, %1, %cst {dimension_numbers = #tpu.dot_dimension_numbers<[1], [0], [0], [1], [0, 0, 1, 1], [], []>} : vector<8x32xf32>, vector<32x1024xf32>, vector<8x1024xf32> -> vector<8x1024xf32>
    %c0_3 = arith.constant 0 : index
    %c0_4 = arith.constant 0 : index
    %3 = vector.load %arg5[%c0_3, %c0_4] : memref<1x1024xf32, #tpu.memory_space<vmem>>, vector<1x1024xf32>
    %4 = vector.broadcast %3 : vector<1x1024xf32> to vector<8x1024xf32>
    %5 = arith.addf %2, %4 : vector<8x1024xf32>
    %cst_5 = arith.constant 0.000000e+00 : f32
    %6 = vector.broadcast %cst_5 : f32 to vector<8x1024xf32>
    %7 = arith.maximumf %5, %6 : vector<8x1024xf32>
    %c0_6 = arith.constant 0 : index
    %c0_7 = arith.constant 0 : index
    %8 = vector.load %arg6[%c0_6, %c0_7] : memref<1024x128xf32, #tpu.memory_space<vmem>>, vector<1024x128xf32>
    %cst_8 = arith.constant dense<0.000000e+00> : vector<8x128xf32>
    %9 = tpu.matmul %7, %8, %cst_8 {dimension_numbers = #tpu.dot_dimension_numbers<[1], [0], [0], [1], [0, 0, 1, 1], [], []>} : vector<8x1024xf32>, vector<1024x128xf32>, vector<8x128xf32> -> vector<8x128xf32>
    %c0_9 = arith.constant 0 : index
    %c0_10 = arith.constant 0 : index
    %10 = vector.load %arg7[%c0_9, %c0_10] : memref<1x128xf32, #tpu.memory_space<vmem>>, vector<1x128xf32>
    %11 = vector.broadcast %10 : vector<1x128xf32> to vector<8x128xf32>
    %12 = arith.addf %9, %11 : vector<8x128xf32>
    %cst_11 = arith.constant 0.000000e+00 : f32
    %13 = vector.broadcast %cst_11 : f32 to vector<8x128xf32>
    %14 = arith.maximumf %12, %13 : vector<8x128xf32>
    %c0_12 = arith.constant 0 : index
    %c0_13 = arith.constant 0 : index
    %15 = vector.load %arg8[%c0_12, %c0_13] : memref<128x128xf32, #tpu.memory_space<vmem>>, vector<128x128xf32>
    %cst_14 = arith.constant dense<0.000000e+00> : vector<8x128xf32>
    %16 = tpu.matmul %14, %15, %cst_14 {dimension_numbers = #tpu.dot_dimension_numbers<[1], [0], [0], [1], [0, 0, 1, 1], [], []>} : vector<8x128xf32>, vector<128x128xf32>, vector<8x128xf32> -> vector<8x128xf32>
    %c0_15 = arith.constant 0 : index
    %c0_16 = arith.constant 0 : index
    %17 = vector.load %arg9[%c0_15, %c0_16] : memref<1x128xf32, #tpu.memory_space<vmem>>, vector<1x128xf32>
    %18 = vector.broadcast %17 : vector<1x128xf32> to vector<8x128xf32>
    %19 = arith.addf %16, %18 : vector<8x128xf32>
    %c0_17 = arith.constant 0 : index
    %c0_18 = arith.constant 0 : index
    %20 = vector.load %arg1[%c0_17, %c0_18] : memref<8x1xi32, #tpu.memory_space<vmem>>, vector<8x1xi32>
    %c0_19 = arith.constant 0 : index
    %c0_20 = arith.constant 0 : index
    %21 = vector.load %arg2[%c0_19, %c0_20] : memref<1x128xi32, #tpu.memory_space<vmem>>, vector<1x128xi32>
    %22 = vector.broadcast %21 : vector<1x128xi32> to vector<8x128xi32>
    %23 = vector.broadcast %20 : vector<8x1xi32> to vector<8x128xi32>
    %24 = arith.cmpi eq, %22, %23 : vector<8x128xi32>
    %cst_21 = arith.constant 0xFF800000 : f32
    %25 = vector.broadcast %cst_21 : f32 to vector<8x128xf32>
    %26 = arith.select %24, %19, %25 : vector<8x128xi1>, vector<8x128xf32>
    %c0_22 = arith.constant 0 : index
    %c0_23 = arith.constant 0 : index
    %27 = vector.load %arg10[%c0_22, %c0_23] : memref<8x128xf32, #tpu.memory_space<vmem>>, vector<8x128xf32>
    tpu.vector_store %arg10[%c0_22, %c0_23], %26 {strides = array<i32>} : memref<8x128xf32, #tpu.memory_space<vmem>>, vector<8x128xf32>,
    return
  }
  func.func @transform_0(%arg0: i32) -> (i32, i32) {
    %c0_i32 = arith.constant 0 : i32
    %c0_i32_0 = arith.constant 0 : i32
    return %arg0, %c0_i32 : i32, i32
  }
  func.func @transform_1(%arg0: i32) -> (i32, i32) {
    %c0_i32 = arith.constant 0 : i32
    %c0_i32_0 = arith.constant 0 : i32
    %c0_i32_1 = arith.constant 0 : i32
    return %c0_i32, %c0_i32_0 : i32, i32
  }
  func.func @transform_2(%arg0: i32) -> (i32, i32) {
    %c0_i32 = arith.constant 0 : i32
    %c0_i32_0 = arith.constant 0 : i32
    return %arg0, %c0_i32 : i32, i32
  }
  func.func @transform_3(%arg0: i32) -> (i32, i32) {
    %c0_i32 = arith.constant 0 : i32
    %c0_i32_0 = arith.constant 0 : i32
    %c0_i32_1 = arith.constant 0 : i32
    return %c0_i32, %c0_i32_0 : i32, i32
  }
  func.func @transform_4(%arg0: i32) -> (i32, i32) {
    %c0_i32 = arith.constant 0 : i32
    %c0_i32_0 = arith.constant 0 : i32
    %c0_i32_1 = arith.constant 0 : i32
    return %c0_i32, %c0_i32_0 : i32, i32
  }
  func.func @transform_5(%arg0: i32) -> (i32, i32) {
    %c0_i32 = arith.constant 0 : i32
    %c0_i32_0 = arith.constant 0 : i32
    %c0_i32_1 = arith.constant 0 : i32
    return %c0_i32, %c0_i32_0 : i32, i32
  }
  func.func @transform_6(%arg0: i32) -> (i32, i32) {
    %c0_i32 = arith.constant 0 : i32
    %c0_i32_0 = arith.constant 0 : i32
    %c0_i32_1 = arith.constant 0 : i32
    return %c0_i32, %c0_i32_0 : i32, i32
  }
  func.func @transform_7(%arg0: i32) -> (i32, i32) {
    %c0_i32 = arith.constant 0 : i32
    %c0_i32_0 = arith.constant 0 : i32
    %c0_i32_1 = arith.constant 0 : i32
    return %c0_i32, %c0_i32_0 : i32, i32
  }
  func.func @transform_8(%arg0: i32) -> (i32, i32) {
    %c0_i32 = arith.constant 0 : i32
    %c0_i32_0 = arith.constant 0 : i32
    %c0_i32_1 = arith.constant 0 : i32
    return %c0_i32, %c0_i32_0 : i32, i32
  }
  func.func @transform_9(%arg0: i32) -> (i32, i32) {
    %c0_i32 = arith.constant 0 : i32
    %c0_i32_0 = arith.constant 0 : i32
    return %arg0, %c0_i32 : i32, i32
  }
}

</mosaic_0001>

<bundles_post_ra>
// kernel: tpu_custom_call.1
= control target key start
LH: loop header
LB: loop body
LE: loop exit
PB: predicated region body
PF: predicated region fallthrough
CT: control target
= control target key end

     0   :  { %14 = vsyncpa [#allocation3], 0  ;;  %s2442_s0 = inlined_call_operand.vmem [shape: s32[24,1], index: 0, kind: input, shape index: {}]   ;;  %s2443_s1 = inlined_call_operand.hbm [shape: s32[1,128], index: 1, kind: input, shape index: {}]   ;;  %s2444_s2 = inlined_call_operand.vmem [shape: f32[24,32], index: 2, kind: input, shape index: {}]   ;;  %s2445_s3 = inlined_call_operand.hbm [shape: f32[32,1024], index: 3, kind: input, shape index: {}]   ;;  %s2446_s4 = inlined_call_operand.vmem [shape: f32[1,1024], index: 4, kind: input, shape index: {}]   ;;  %s2447_s5 = inlined_call_operand.hbm [shape: f32[1024,128], index: 5, kind: input, shape index: {}]   ;;  %s2448_s6 = inlined_call_operand.vmem [shape: f32[1,128], index: 6, kind: input, shape index: {}]   ;;  %s2449_s7 = inlined_call_operand.hbm [shape: f32[128,128], index: 7, kind: input, shape index: {}]   ;;  %s2450_s8 = inlined_call_operand.vmem [shape: f32[1,128], index: 8, kind: input, shape index: {}]   ;;  %s2451_s9 = inlined_call_operand.hbm [shape: f32[24,128], index: 9, kind: output, shape index: {}]  }
   0x1   :  { %15 = vsyncpa [#allocation6], 0 }
   0x2   :  { %16 = vsyncpa [#allocation9], 0 }
   0x3   :  { %17 = vsyncpa [#allocation4], 0 }
   0x4   :  { %19 = vsyncpa [#allocation4 + $0x1], 0  ;;  %s2162_s30 = smov 0   ;;  %s2164_s10 = smov 0  }
   0x5   :  { %s2166_s11 = smov 0   ;;  %s2168_s12 = smov 0  }
   0x6 LB: > { %2460 = sst [smem:[#allocation15_spill]] %s2085_s30  ;;  %s2183_s13 = sadd.s32 4294967295, %s2097_s12   ;;  %s2097_s12 = sphi %s2168_s12, %s2481_s12   ;;  %s2093_s11 = sphi %s2166_s11, %s2483_s11   ;;  %s2089_s10 = sphi %s2164_s10, %s2485_s10   ;;  %s2085_s30 = sphi %s2162_s30, %s2484_s30  }
   0x7   : > { %2461 = sst [smem:[#allocation16_spill]] %s2093_s11  ;;  %s1420_s14 = sadd.s32 4294967294, %s2097_s12  }
   0x8   : > { %s2187_s15 = sadd.s32 1, %s2097_s12   ;;  %s231_s16 = sadd.s32 1, %s2093_s11 }
   0x9   : > { %2462 = sst [smem:[#allocation17_spill]] %s2187_s15  ;;  %s228_s17 = ssub.s32 %s2097_s12, %s2187_s15 }
   0xa   : > { %p241_p0 = scmp.ne.s32.totalorder %s2093_s11, %s2089_s10  ;;  %p229_p1 = scmp.eq.s32.totalorder %s228_s17, 0 }
   0xb   : > { %p242_p2 = scmp.eq.s32.totalorder %s2183_s13, 2  ;;  %p247_p3 = scmp.ne.s32.totalorder %s2089_s10, %s2085_s30 }
   0xc   : > { %p248_p4 = scmp.eq.s32.totalorder %s1420_s14, 2  ;;  %p1421_p7 = scmp.ge.s32.totalorder %s2097_s12, 1 }
   0xd   : > { %s2198_s18 = scalar_select %p229_p1, %s2093_s11, %s231_s16  }
   0xe   : > { %p2200_p5 = por %p242_p2, %p241_p0  ;;  %p2204_p6 = por %p248_p4, %p247_p3 }
   0xf   : > { %2463 = sst [smem:[#allocation18_spill]] %s2198_s18  ;;  %p255_p8 = scmp.lt.s32.totalorder %s2097_s12, 4 }
  0x10   : > { %s2464_s19 = scalar_select %p2200_p5, 1, 0 }
  0x11   : > { %s2465_s20 = scalar_select %p2204_p6, 1, 0 }
  0x12   : > { %p2452_p9 = scmp.eq.s32.totalorder %s2183_s13, 0  ;;  %p2211_p10 = pnand %p1421_p7, %p255_p8 }
  0x13   : > { %2466 = sst [smem:[#allocation19_spill]] %s2465_s20  ;;  %s2099_s22 = smov [#allocation5]  }
  0x14   : > { %s2467_s21 = scalar_select %p2211_p10, 1, 0 }
  0x15   : > { %s278_s23 = sshll.u32 %s2099_s22, 4  ;;  %p1840_p11 = pneg %p2211_p10  ;;  %s2217_s23 = int_to_ptr.vmem [resolvable:$true] %s278_s23 }
  0x16   : > { %s2100_s25 = smov [#allocation2]   ;;  %s2101_s27 = smov [#allocation7]  }
  0x17   : > { %p2221_p12 = pnand %p2452_p9, %p1840_p11  ;;  %s268_s26 = sshll.u32 %s2100_s25, 4  ;;  %s2225_s26 = int_to_ptr.vmem [resolvable:$true] %s268_s26 }
  0x18   : > { %s2227_s28 = sshll.u32 %s2101_s27, 4  ;;  %s1911_s16 = scalar_lea.hbm %s2445_s3, 4096  ;;  %s295_s28 = int_to_ptr.vmem [resolvable:$true] %s2227_s28 }
  0x19   : > { %p1912_p13 = scmp.ne.s32.totalorder %s2445_s3, %s1911_s16  ;;  %p2237_p0 = pneg %p2221_p12 }
  0x1a   : > { %p1918_p3 = scmp.lt.u32.totalorder %s1911_s16, %s2445_s3 }
  0x1b   : > { %p1914_p1 = pnand %p2237_p0, %p1912_p13 }
  0x1d   : > { %p1915_p2 = pneg %p1914_p1 }
  0x1f   : > { %p1920_p4 = pnand %p1918_p3, %p1915_p2 }
  0x21   : > { %1923 = shalt.err (!%p1920_p4)
}
  0x22   : > { %s1924_s29 = scalar_lea.vmem %s2217_s23, 4096  ;;  %p1932_p9 = scmp.lt.s32.totalorder %s2217_s23, %s2217_s23 }
  0x23   : > { %p1925_p7 = scmp.ne.s32.totalorder %s2217_s23, %s1924_s29  ;;  %p1933_p6 = scmp.lt.s32.totalorder %s1924_s29, %s1924_s29 }
  0x25   : > { %p1927_p8 = pnand %p1925_p7, %p2237_p0  ;;  %p1934_p13 = por %p1933_p6, %p1932_p9 }
  0x27   : > { %p1928_p11 = pneg %p1927_p8 }
  0x29   : > { %p1935_p1 = pnand %p1934_p13, %p1928_p11 }
  0x2b   : > { %1938 = shalt.err (!%p1935_p1)
}
  0x2c   : > { %s2102_s14 = smov 1024   ;;  %s2103_s16 = smov 64  }
  0x2d   : > { %1846 = dma.hbm_to_vmem [thread:$0]  (!%p2221_p12), %s2445_s3, 4096, %s2217_s23, [#allocation6], %s2102_s14, %s2102_s14, %s2103_s16  }
  0x2e   : > { %s1939_s11 = scalar_lea.hbm %s2443_s1, 16 }
  0x2f   : > { %p1940_p6 = scmp.ne.s32.totalorder %s2443_s1, %s1939_s11  ;;  %p1946_p3 = scmp.lt.u32.totalorder %s1939_s11, %s2443_s1 }
  0x31   : > { %p1942_p9 = pnand %p1940_p6, %p2237_p0 }
  0x33   : > { %p1943_p2 = pneg %p1942_p9 }
  0x35   : > { %p1948_p4 = pnand %p1946_p3, %p1943_p2 }
  0x37   : > { %1951 = shalt.err (!%p1948_p4)
}
  0x38   : > { %s1952_s23 = scalar_lea.vmem %s2225_s26, 16  ;;  %s1959_s15 = scalar_lea.vmem %s2225_s26, 32 }
  0x39   : > { %p1953_p7 = scmp.ne.s32.totalorder %s2225_s26, %s1952_s23  ;;  %p1960_p13 = scmp.lt.s32.totalorder %s2225_s26, %s2225_s26 }
  0x3a   : > { %p1961_p1 = scmp.lt.s32.totalorder %s1959_s15, %s1952_s23 }
  0x3b   : > { %p1955_p8 = pnand %p1953_p7, %p2237_p0 }
  0x3c   : > { %p1962_p6 = por %p1961_p1, %p1960_p13 }
  0x3d   : > { %p1956_p11 = pneg %p1955_p8 }
  0x3f   : > { %p1963_p9 = pnand %p1962_p6, %p1956_p11 }
  0x41   : > { %1966 = shalt.err (!%p1963_p9)
}
  0x42   : > { %1843 = dma.hbm_to_vmem [thread:$0]  (!%p2221_p12), %s2443_s1, 16, %s2225_s26, [#allocation3]  }
  0x43   : > { %s1967_s16 = scalar_lea.hbm %s2447_s5, 16384 }
  0x44   : > { %p1968_p2 = scmp.ne.s32.totalorder %s2447_s5, %s1967_s16  ;;  %p1974_p7 = scmp.lt.u32.totalorder %s1967_s16, %s2447_s5 }
  0x46   : > { %p1970_p3 = pnand %p1968_p2, %p2237_p0 }
  0x48   : > { %p1971_p4 = pneg %p1970_p3 }
  0x4a   : > { %p1976_p8 = pnand %p1974_p7, %p1971_p4 }
  0x4c   : > { %1979 = shalt.err (!%p1976_p8)
}
  0x4d   : > { %s1980_s29 = scalar_lea.vmem %s295_s28, 16384  ;;  %p1988_p6 = scmp.lt.s32.totalorder %s295_s28, %s295_s28 }
  0x4e   : > { %p1981_p11 = scmp.ne.s32.totalorder %s295_s28, %s1980_s29  ;;  %p1989_p9 = scmp.lt.s32.totalorder %s1980_s29, %s1980_s29 }
  0x50   : > { %p1983_p13 = pnand %p1981_p11, %p2237_p0  ;;  %p1990_p5 = por %p1989_p9, %p1988_p6 }
  0x52   : > { %p1984_p1 = pneg %p1983_p13 }
  0x54   : > { %p1991_p10 = pnand %p1990_p5, %p1984_p1 }
  0x56   : > { %1994 = shalt.err (!%p1991_p10)
}
  0x57   : > { %s2104_s26 = smov 128   ;;  %s2105_s23 = smov 8  }
  0x58   : > { %1849 = dma.hbm_to_vmem [thread:$0]  (!%p2221_p12), %s2447_s5, 16384, %s295_s28, [#allocation6], %s2104_s26, %s2104_s26, %s2105_s23  }
  0x59   : > { %s2106_s11 = smov [#allocation8]   ;;  %s1995_s17 = scalar_lea.hbm %s2449_s7, 2048 }
  0x5a   : > { %s310_s20 = sshll.u32 %s2106_s11, 4  ;;  %p1996_p5 = scmp.ne.s32.totalorder %s2449_s7, %s1995_s17  ;;  %s311_s20 = int_to_ptr.vmem [resolvable:$true] %s310_s20 }
  0x5b   : > { %p2002_p3 = scmp.lt.u32.totalorder %s1995_s17, %s2449_s7 }
  0x5c   : > { %p1998_p10 = pnand %p1996_p5, %p2237_p0 }
  0x5e   : > { %p1999_p2 = pneg %p1998_p10 }
  0x60   : > { %p2004_p4 = pnand %p2002_p3, %p1999_p2 }
  0x62   : > { %2007 = shalt.err (!%p2004_p4)
}
  0x63   : > { %s2008_s28 = scalar_lea.vmem %s311_s20, 2048  ;;  %p2016_p13 = scmp.lt.s32.totalorder %s311_s20, %s311_s20 }
  0x64   : > { %p2009_p7 = scmp.ne.s32.totalorder %s311_s20, %s2008_s28  ;;  %p2017_p1 = scmp.lt.s32.totalorder %s2008_s28, %s2008_s28 }
  0x66   : > { %p2011_p8 = pnand %p2009_p7, %p2237_p0  ;;  %p2018_p6 = por %p2017_p1, %p2016_p13 }
  0x68   : > { %p2012_p11 = pneg %p2011_p8 }
  0x6a   : > { %p2019_p9 = pnand %p2018_p6, %p2012_p11 }
  0x6c   : > { %2022 = shalt.err (!%p2019_p9)
}
  0x6d   : > { %1852 = dma.hbm_to_vmem [thread:$0]  (!%p2221_p12), %s2449_s7, 2048, %s311_s20, [#allocation9], %s2104_s26, %s2104_s26, %s2105_s23  }
  0x6e   : > { %p2470_p5 = scmp.ne.s32.totalorder %s2467_s21, 0 }
  0x6f   : > { %p2471_p10 = scmp.eq.s32.totalorder (!%p2470_p5), %s2183_s13, 0 }
  0x70   : > { %343 = sbr.rel (%p2470_p5) target bundleno = 845 (0x34d), region = 56 }
  0x77   : > { %2068 = dma.done.wait (%p2471_p10), [#allocation3], 16   ;;  %p2472_p0 = pmov %p2471_p10 }
  0x79   : > { %2070 = vsyncadd (%p2472_p0), [#allocation3], 4294967280  ;;  %p2473_p2 = pmov %p2472_p0 }
  0x7a   : > { %p2474_p3 = pmov %p2472_p0 }
  0x7b   : > { %2072 = dma.done.wait (%p2473_p2), [#allocation6], 20480  }
  0x7c   : > { %2074 = vsyncadd (%p2474_p3), [#allocation6], 4294946816  ;;  %p2475_p4 = pmov %p2472_p0 }
  0x7d   : > { %p2476_p12 = pmov %p2472_p0 }
  0x7e   : > { %2076 = dma.done.wait (%p2475_p4), [#allocation9], 2048  }
  0x7f   : > { %2078 = vsyncadd (%p2476_p12), [#allocation9], 4294965248  ;;  %v2107_v0 = vmov 0.0   ;;  %p394_p7 = scmp.lt.s32.totalorder %s2183_s13, 2  ;;  %v404_v1 = vld [vmem:[#allocation5 + $0x8] sm:$0xff]  ;;  %v403_v3 = vld [vmem:[#allocation5] sm:$0xff] }
  0x80   : > { %545 = vmatprep.mubr.f32.mxu1 %v2107_v0  ;;  %v412_v2 = vld [vmem:[#allocation5 + $0x48] sm:$0xff]  ;;  %v411_v5 = vld [vmem:[#allocation5 + $0x40] sm:$0xff]  ;;  %v406_v12 = vld [vmem:[#allocation5 + $0x18] sm:$0xff]  ;;  %vm477_vm0 = vcmask 261120   ;;  %vm2109_vm1 = vmmov 0   ;;  %s391_s27 = sand.u32 1, %s2089_s10  }
  0x81   : > { %s2336_s18 = scalar_select %p394_p7, %s2183_s13, 2  ;;  %v1638_v4 = vpack.c.bf16 %v412_v2, %v404_v1  ;;  %v420_v6 = vld [vmem:[#allocation5 + $0x88] sm:$0xff]  ;;  %v1640_v8 = vpack.c.bf16 %v411_v5, %v403_v3  ;;  %v419_v10 = vld [vmem:[#allocation5 + $0x80] sm:$0xff]  ;;  %v414_v13 = vld [vmem:[#allocation5 + $0x58] sm:$0xff] }
  0x82   : > { %v428_v7 = vld [vmem:[#allocation5 + $0xc8] sm:$0xff]  ;;  %v427_v11 = vld [vmem:[#allocation5 + $0xc0] sm:$0xff]  ;;  %v1646_v15 = vpack.c.bf16 %v414_v13, %v406_v12  ;;  %v405_v16 = vld [vmem:[#allocation5 + $0x10] sm:$0xff]  ;;  %s1432_s29 = sshll.u32 %s391_s27, 3  ;;  %s1443_s30 = sshll.u32 %s2183_s13, 7 }
  0x83   : > { %v1642_v9 = vpack.c.bf16 %v428_v7, %v420_v6  ;;  %s1433_s21 = sshll.u32 %s2336_s18, 3  ;;  %1639 = vmatprep.subr.bf16.mxu1 %v1638_v4  ;;  %v1644_v14 = vpack.c.bf16 %v427_v11, %v419_v10  ;;  %v413_v17 = vld [vmem:[#allocation5 + $0x50] sm:$0xff]  ;;  %v422_v18 = vld [vmem:[#allocation5 + $0x98] sm:$0xff]  ;;  %v408_v25 = vld [vmem:[#allocation5 + $0x28] sm:$0xff]  ;;  %s393_s18 = scalar_lea.vmem [#allocation10], %s1432_s29 }
  0x84   : > { %1641 = vmatpush1.bf16.msra.mxu1 %v1640_v8  ;;  %s401_s23 = scalar_lea.vmem %s2444_s2, %s1433_s21  ;;  %v430_v19 = vld [vmem:[#allocation5 + $0xd8] sm:$0xff]  ;;  %v1648_v21 = vpack.c.bf16 %v413_v17, %v405_v16  ;;  %v421_v23 = vld [vmem:[#allocation5 + $0x90] sm:$0xff]  ;;  %v416_v26 = vld [vmem:[#allocation5 + $0x68] sm:$0xff]  ;;  %s397_s17 = scalar_lea.vmem %s2442_s0, %s1433_s21 }
  0x85   : > { %1643 = vmatprep.subr.bf16.mxu1 %v1642_v9  ;;  %v2344_v20 = vld [vmem:[%s401_s23] sm:$0xff]  ;;  %v1650_v22 = vpack.c.bf16 %v430_v19, %v422_v18  ;;  %v429_v24 = vld [vmem:[#allocation5 + $0xd0] sm:$0xff]  ;;  %v792_v36 = vld [vmem:[#allocation7 + $0x98] sm:$0xff]  ;;  %v1654_v37 = vpack.c.bf16 %v416_v26, %v408_v25  ;;  %s1308_s21 = sshll.u32 %s393_s18, 4  ;;  %s2400_s23 = scalar_lea.hbm %s2451_s9, %s1443_s30  ;;  %s2402_s21 = int_to_ptr.vmem [resolvable:$true] %s1308_s21 }
  0x86   : > { %v407_v27 = vld [vmem:[#allocation5 + $0x20] sm:$0xff]  ;;  %v790_v30 = vld [vmem:[#allocation7 + $0x88] sm:$0xff]  ;;  %v1652_v32 = vpack.c.bf16 %v429_v24, %v421_v23  ;;  %v791_v35 = vld [vmem:[#allocation7 + $0x90] sm:$0xff]  ;;  %s1295_s11 = scalar_lea.sflag [#allocation4], %s391_s27  ;;  %s2023_s13 = scalar_lea.vmem %s2402_s21, 128 }
  0x87   : > { %v415_v28 = vld [vmem:[#allocation5 + $0x60] sm:$0xff]  ;;  %v774_v34 = vld [vmem:[#allocation7 + $0x8] sm:$0xff]  ;;  %v1674_v40 = vpack.c.bf16 %v792_v36, %v791_v35  ;;  %v775_v41 = vld [vmem:[#allocation7 + $0x10] sm:$0xff]  ;;  %p2024_p8 = scmp.ne.s32.totalorder %s2402_s21, %s2023_s13  ;;  %p2477_p11 = scmp.ne.s32.totalorder %s2464_s19, 0 }
  0x88   : > { %1645 = vmatpush1.bf16.msra.mxu1 %v1644_v14  ;;  %v789_v29 = vld [vmem:[#allocation7 + $0x80] sm:$0xff]  ;;  %v424_v38 = vld [vmem:[#allocation5 + $0xa8] sm:$0xff]  ;;  %v776_v42 = vld [vmem:[#allocation7 + $0x18] sm:$0xff]  ;;  %v1656_v47 = vpack.c.bf16 %v415_v28, %v407_v27  ;;  %s2111_s20 = smov [#allocation10]  }
  0x89   : > { %1647 = vmatprep.subr.bf16.mxu1 %v1646_v15  ;;  %v773_v31 = vld [vmem:[#allocation7] sm:$0xff]  ;;  %v1670_v33 = vpack.c.bf16 %v790_v30, %v789_v29  ;;  %v432_v43 = vld [vmem:[#allocation5 + $0xe8] sm:$0xff]  ;;  %v1676_v46 = vpack.c.bf16 %v776_v42, %v775_v41  ;;  %v795_v54 = vld [vmem:[#allocation7 + $0xb0] sm:$0xff]  ;;  %p2025_p13 = pnand %p2024_p8, %p2477_p11  ;;  %s2027_s14 = sshll.u32 %s2111_s20, 4  ;;  %s2028_s14 = int_to_ptr.vmem [resolvable:$false] %s2027_s14 }
  0x8a   : > { %v1672_v39 = vpack.c.bf16 %v774_v34, %v773_v31  ;;  %v793_v44 = vld [vmem:[#allocation7 + $0xa0] sm:$0xff]  ;;  %v794_v45 = vld [vmem:[#allocation7 + $0xa8] sm:$0xff]  ;;  %v1658_v51 = vpack.c.bf16 %v432_v43, %v424_v38  ;;  %v796_v55 = vld [vmem:[#allocation7 + $0xb8] sm:$0xff]  ;;  %s2029_s16 = scalar_lea.vmem %s2028_s14, 256  ;;  %p2030_p6 = scmp.lt.s32.totalorder %s2402_s21, %s2028_s14 }
  0x8b   : > { %1435 = vmatmul.mubr.msk.f32.vlgmr.msra.gmra.mrb[0].mxu1 %vm477_vm0, %v2344_v20  ;;  %1671 = vmatprep.subr.bf16.mxu0 %v1670_v33  ;;  %v423_v48 = vld [vmem:[#allocation5 + $0xa0] sm:$0xff]  ;;  %v778_v50 = vld [vmem:[#allocation7 + $0x28] sm:$0xff]  ;;  %v1678_v53 = vpack.c.bf16 %v794_v45, %v793_v44  ;;  %v410_v56 = vld [vmem:[#allocation5 + $0x38] sm:$0xff]  ;;  %v1682_v60 = vpack.c.bf16 %v796_v55, %v795_v54  ;;  %p2026_p1 = pneg %p2025_p13  ;;  %p2031_p9 = scmp.lt.s32.totalorder %s2029_s16, %s2023_s13 }
  0x8c   : > { %1649 = vmatpush1.bf16.msra.mxu1 %v1648_v21  ;;  %616 = vmatprep.mubr.f32.mxu1 %v2107_v0  ;;  %v777_v49 = vld [vmem:[#allocation7 + $0x20] sm:$0xff]  ;;  %v418_v57 = vld [vmem:[#allocation5 + $0x78] sm:$0xff]  ;;  %v779_v61 = vld [vmem:[#allocation7 + $0x30] sm:$0xff] }
  0x8d   : > { %1651 = vmatprep.subr.bf16.mxu1 %v1650_v22  ;;  %1673 = vmatpush3.bf16.msra.mxu0 %v1672_v39  ;;  %v431_v52 = vld [vmem:[#allocation5 + $0xe0] sm:$0xff]  ;;  %v1680_v58 = vpack.c.bf16 %v778_v50, %v777_v49  ;;  %v780_v62 = vld [vmem:[#allocation7 + $0x38] sm:$0xff]  ;;  %v1662_v63 = vpack.c.bf16 %v418_v57, %v410_v56  ;;  %v409_v1 = vld [vmem:[#allocation5 + $0x30] sm:$0xff]  ;;  %p2032_p5 = por %p2031_p9, %p2030_p6 }
  0x8e   : > { %1675 = vmatprep.subr.bf16.mxu0 %v1674_v40  ;;  %v1660_v59 = vpack.c.bf16 %v431_v52, %v423_v48  ;;  %v417_v2 = vld [vmem:[#allocation5 + $0x70] sm:$0xff]  ;;  %v426_v3 = vld [vmem:[#allocation5 + $0xb8] sm:$0xff]  ;;  %v797_v5 = vld [vmem:[#allocation7 + $0xc0] sm:$0xff]  ;;  %v1684_v7 = vpack.c.bf16 %v780_v62, %v779_v61 }
  0x8f   : > { %v434_v4 = vld [vmem:[#allocation5 + $0xf8] sm:$0xff]  ;;  %v798_v6 = vld [vmem:[#allocation7 + $0xc8] sm:$0xff]  ;;  %v1664_v8 = vpack.c.bf16 %v417_v2, %v409_v1  ;;  %v425_v9 = vld [vmem:[#allocation5 + $0xb0] sm:$0xff]  ;;  %p2033_p10 = pnand %p2032_p5, %p2026_p1 }
  0x90   : > { %1653 = vmatpush1.bf16.msra.mxu1 %v1652_v32  ;;  %v781_v10 = vld [vmem:[#allocation7 + $0x40] sm:$0xff]  ;;  %v782_v11 = vld [vmem:[#allocation7 + $0x48] sm:$0xff]  ;;  %v1666_v12 = vpack.c.bf16 %v434_v4, %v426_v3  ;;  %v433_v13 = vld [vmem:[#allocation5 + $0xf0] sm:$0xff]  ;;  %v1686_v14 = vpack.c.bf16 %v798_v6, %v797_v5 }
  0x91   : > { %1655 = vmatprep.subr.bf16.mxu1 %v1654_v37  ;;  %1677 = vmatpush3.bf16.msra.mxu0 %v1676_v46  ;;  %v799_v15 = vld [vmem:[#allocation7 + $0xd0] sm:$0xff]  ;;  %v800_v16 = vld [vmem:[#allocation7 + $0xd8] sm:$0xff]  ;;  %v821_v17 = vld [vmem:[#allocation7 + $0x180] sm:$0xff]  ;;  %v1688_v19 = vpack.c.bf16 %v782_v11, %v781_v10  ;;  %v1668_v21 = vpack.c.bf16 %v433_v13, %v425_v9 }
  0x92   : > { %1679 = vmatprep.subr.bf16.mxu0 %v1678_v53  ;;  %v822_v18 = vld [vmem:[#allocation7 + $0x188] sm:$0xff]  ;;  %v805_v22 = vld [vmem:[#allocation7 + $0x100] sm:$0xff]  ;;  %v1690_v23 = vpack.c.bf16 %v800_v16, %v799_v15  ;;  %v783_v24 = vld [vmem:[#allocation7 + $0x50] sm:$0xff] }
  0x93   : > { %1436 = vmatmul.mubr.msk.f32.vlgmr.msra.gmra.mrb[2].mxu1 %vm477_vm0, %v2344_v20  ;;  %v784_v25 = vld [vmem:[#allocation7 + $0x58] sm:$0xff]  ;;  %v1702_v26 = vpack.c.bf16 %v822_v18, %v821_v17  ;;  %v806_v27 = vld [vmem:[#allocation7 + $0x108] sm:$0xff]  ;;  %v801_v28 = vld [vmem:[#allocation7 + $0xe0] sm:$0xff] }
  0x94   : > { %1657 = vmatpush1.bf16.msra.mxu1 %v1656_v47  ;;  %687 = vmatprep.mubr.f32.mxu1 %v2107_v0  ;;  %v802_v29 = vld [vmem:[#allocation7 + $0xe8] sm:$0xff]  ;;  %v823_v30 = vld [vmem:[#allocation7 + $0x190] sm:$0xff]  ;;  %v824_v31 = vld [vmem:[#allocation7 + $0x198] sm:$0xff]  ;;  %v1692_v32 = vpack.c.bf16 %v784_v25, %v783_v24  ;;  %v1704_v33 = vpack.c.bf16 %v806_v27, %v805_v22  ;;  %v437_v27 = vlaneseq }
  0x95   : > { %1659 = vmatprep.subr.bf16.mxu1 %v1658_v51  ;;  %1681 = vmatpush3.bf16.msra.mxu0 %v1680_v58  ;;  %v1694_v34 = vpack.c.bf16 %v802_v29, %v801_v28  ;;  %v785_v35 = vld [vmem:[#allocation7 + $0x60] sm:$0xff]  ;;  %v786_v36 = vld [vmem:[#allocation7 + $0x68] sm:$0xff]  ;;  %v1706_v37 = vpack.c.bf16 %v824_v31, %v823_v30  ;;  %v807_v38 = vld [vmem:[#allocation7 + $0x110] sm:$0xff] }
  0x96   : > { %1683 = vmatprep.subr.bf16.mxu0 %v1682_v60  ;;  %v808_v39 = vld [vmem:[#allocation7 + $0x118] sm:$0xff]  ;;  %v825_v40 = vld [vmem:[#allocation7 + $0x1a0] sm:$0xff]  ;;  %v826_v41 = vld [vmem:[#allocation7 + $0x1a8] sm:$0xff]  ;;  %v1696_v42 = vpack.c.bf16 %v786_v36, %v785_v35  ;;  %v2357_v28 = vshrl.u32 %v437_v27, 7 }
  0x97   : > { %v1708_v43 = vpack.c.bf16 %v808_v39, %v807_v38  ;;  %v1710_v44 = vpack.c.bf16 %v826_v41, %v825_v40  ;;  %v809_v45 = vld [vmem:[#allocation7 + $0x120] sm:$0xff]  ;;  %v810_v46 = vld [vmem:[#allocation7 + $0x128] sm:$0xff]  ;;  %v827_v47 = vld [vmem:[#allocation7 + $0x1b0] sm:$0xff] }
  0x98   : > { %1661 = vmatpush1.bf16.msra.mxu1 %v1660_v59  ;;  %v828_v48 = vld [vmem:[#allocation7 + $0x1b8] sm:$0xff]  ;;  %v1712_v49 = vpack.c.bf16 %v810_v46, %v809_v45  ;;  %v811_v51 = vld [vmem:[#allocation7 + $0x130] sm:$0xff]  ;;  %v829_v53 = vld [vmem:[#allocation7 + $0x1c0] sm:$0xff]  ;;  %v439_v29 = vsub.s32 0, %v2357_v28  ;;  %v443_v31 = vsub.s32 1, %v2357_v28  ;;  %v447_v39 = vsub.s32 2, %v2357_v28 }
  0x99   : > { %1663 = vmatprep.subr.bf16.mxu1 %v1662_v63  ;;  %1685 = vmatpush3.bf16.msra.mxu0 %v1684_v7  ;;  %v1714_v50 = vpack.c.bf16 %v828_v48, %v827_v47  ;;  %v812_v52 = vld [vmem:[#allocation7 + $0x138] sm:$0xff]  ;;  %v813_v56 = vld [vmem:[#allocation7 + $0x140] sm:$0xff]  ;;  %v814_v57 = vld [vmem:[#allocation7 + $0x148] sm:$0xff]  ;;  %v451_v41 = vsub.s32 3, %v2357_v28 }
  0x9a   : > { %1687 = vmatprep.subr.bf16.mxu0 %v1686_v14  ;;  %v1716_v54 = vpack.c.bf16 %v812_v52, %v811_v51  ;;  %v1720_v58 = vpack.c.bf16 %v814_v57, %v813_v56  ;;  %v803_v59 = vld [vmem:[#allocation7 + $0xf0] sm:$0xff]  ;;  %v804_v60 = vld [vmem:[#allocation7 + $0xf8] sm:$0xff]  ;;  %v834_v9 = vld [vmem:[#allocation7 + $0x1e8] sm:$0xff] }
  0x9b   : > { %1437 = vmatmul.mubr.msk.f32.vlgmr.msra.gmra.mrb[4].mxu1 %vm477_vm0, %v2344_v20  ;;  %v831_v61 = vld [vmem:[#allocation7 + $0x1d0] sm:$0xff]  ;;  %v1698_v62 = vpack.c.bf16 %v804_v60, %v803_v59  ;;  %v832_v63 = vld [vmem:[#allocation7 + $0x1d8] sm:$0xff]  ;;  %v853_v10 = vld [vmem:[#allocation7 + $0x280] sm:$0xff] }
  0x9c   : > { %1665 = vmatpush1.bf16.msra.mxu1 %v1664_v8  ;;  %758 = vmatprep.mubr.f32.mxu1 %v2107_v0  ;;  %v787_v1 = vld [vmem:[#allocation7 + $0x70] sm:$0xff]  ;;  %v788_v2 = vld [vmem:[#allocation7 + $0x78] sm:$0xff]  ;;  %v1722_v3 = vpack.c.bf16 %v832_v63, %v831_v61  ;;  %v833_v8 = vld [vmem:[#allocation7 + $0x1e0] sm:$0xff] }
  0x9d   : > { %1667 = vmatprep.subr.bf16.mxu1 %v1666_v12  ;;  %1689 = vmatpush3.bf16.msra.mxu0 %v1688_v19  ;;  %v1700_v4 = vpack.c.bf16 %v788_v2, %v787_v1  ;;  %v815_v5 = vld [vmem:[#allocation7 + $0x150] sm:$0xff]  ;;  %v816_v6 = vld [vmem:[#allocation7 + $0x158] sm:$0xff]  ;;  %v1726_v11 = vpack.c.bf16 %v834_v9, %v833_v8  ;;  %v854_v12 = vld [vmem:[#allocation7 + $0x288] sm:$0xff] }
  0x9e   : > { %1691 = vmatprep.subr.bf16.mxu0 %v1690_v23  ;;  %v1724_v7 = vpack.c.bf16 %v816_v6, %v815_v5  ;;  %v817_v13 = vld [vmem:[#allocation7 + $0x160] sm:$0xff]  ;;  %v818_v14 = vld [vmem:[#allocation7 + $0x168] sm:$0xff]  ;;  %v1734_v15 = vpack.c.bf16 %v854_v12, %v853_v10  ;;  %v835_v17 = vld [vmem:[#allocation7 + $0x1f0] sm:$0xff] }
  0x9f   : > { %v1728_v16 = vpack.c.bf16 %v818_v14, %v817_v13  ;;  %v836_v18 = vld [vmem:[#allocation7 + $0x1f8] sm:$0xff]  ;;  %v885_v24 = vld [vmem:[#allocation7 + $0x380] sm:$0xff]  ;;  %v886_v25 = vld [vmem:[#allocation7 + $0x388] sm:$0xff] }
  0xa0   : > { %1669 = vmatpush1.bf16.msra.mxu1 %v1668_v21  ;;  %v1730_v19 = vpack.c.bf16 %v836_v18, %v835_v17  ;;  %v819_v21 = vld [vmem:[#allocation7 + $0x170] sm:$0xff]  ;;  %v820_v22 = vld [vmem:[#allocation7 + $0x178] sm:$0xff]  ;;  %v2363_v30 = vld [vmem:[%s2446_s4] sm:$0xff] }
  0xa1   : > { %1703 = vmatprep.subr.bf16.mxu1 %v1702_v26  ;;  %1693 = vmatpush3.bf16.msra.mxu0 %v1692_v32  ;;  %v1732_v23 = vpack.c.bf16 %v820_v22, %v819_v21  ;;  %v1766_v26 = vpack.c.bf16 %v886_v25, %v885_v24  ;;  %v440_v32 = vrot.slane %v2363_v30, %v439_v29  ;;  %v838_v38 = vld [vmem:[#allocation7 + $0x208] sm:$0xff]  ;;  %v857_v52 = vld [vmem:[#allocation7 + $0x2a0] sm:$0xff]  ;;  %v860_v1 = vld [vmem:[#allocation7 + $0x2b8] sm:$0xff] }
  0xa2   : > { %1695 = vmatprep.subr.bf16.mxu0 %v1694_v34  ;;  %v448_v47 = vrot.slane %v2363_v30, %v447_v39  ;;  %v452_v51 = vrot.slane %v2363_v30, %v451_v41  ;;  %v842_v56 = vld [vmem:[#allocation7 + $0x228] sm:$0xff]  ;;  %v869_v60 = vld [vmem:[#allocation7 + $0x300] sm:$0xff]  ;;  %v887_v2 = vld [vmem:[#allocation7 + $0x390] sm:$0xff] }
  0xa3   : > { %1438 = vmatmul.mubr.msk.f32.vlgmr.msra.gmra.mrb[6].mxu1 %vm477_vm0, %v2344_v20  ;;  %v830_v20 = vld [vmem:[#allocation7 + $0x1c8] sm:$0xff]  ;;  %v843_v8 = vld [vmem:[#allocation7 + $0x230] sm:$0xff]  ;;  %v844_v9 = vld [vmem:[#allocation7 + $0x238] sm:$0xff] }
  0xa4   : > { %1705 = vmatpush3.bf16.msra.mxu1 %v1704_v33  ;;  %v1718_v55 = vpack.c.bf16 %v830_v20, %v829_v53  ;;  %v444_v33 = vrot.slane %v2363_v30, %v443_v31  ;;  %v858_v53 = vld [vmem:[#allocation7 + $0x2a8] sm:$0xff]  ;;  %v871_v13 = vld [vmem:[#allocation7 + $0x310] sm:$0xff]  ;;  %v872_v14 = vld [vmem:[#allocation7 + $0x318] sm:$0xff]  ;;  %v1748_v21 = vpack.c.bf16 %v844_v9, %v843_v8 }
  0xa5   : > { %1707 = vmatprep.subr.bf16.mxu1 %v1706_v37  ;;  %1697 = vmatpush3.bf16.msra.mxu0 %v1696_v42  ;;  %v837_v37 = vld [vmem:[#allocation7 + $0x200] sm:$0xff]  ;;  %v855_v42 = vld [vmem:[#allocation7 + $0x290] sm:$0xff]  ;;  %v1742_v59 = vpack.c.bf16 %v858_v53, %v857_v52  ;;  %v870_v61 = vld [vmem:[#allocation7 + $0x308] sm:$0xff]  ;;  %v1772_v22 = vpack.c.bf16 %v872_v14, %v871_v13  ;;  %v455_v53 = vsub.s32 4, %v2357_v28 }
  0xa6   : > { %1699 = vmatprep.subr.bf16.mxu0 %v1698_v62  ;;  %v1736_v46 = vpack.c.bf16 %v838_v38, %v837_v37  ;;  %v859_v62 = vld [vmem:[#allocation7 + $0x2b0] sm:$0xff]  ;;  %v889_v17 = vld [vmem:[#allocation7 + $0x3a0] sm:$0xff]  ;;  %v890_v18 = vld [vmem:[#allocation7 + $0x3a8] sm:$0xff]  ;;  %v467_v38 = vsub.s32 7, %v2357_v28 }
  0xa7   : > { %v846_v24 = vld [vmem:[#allocation7 + $0x248] sm:$0xff]  ;;  %v1774_v27 = vpack.c.bf16 %v890_v18, %v889_v17  ;;  %v873_v29 = vld [vmem:[#allocation7 + $0x320] sm:$0xff]  ;;  %v847_v41 = vld [vmem:[#allocation7 + $0x250] sm:$0xff] }
  0xa8   : > { %1709 = vmatpush3.bf16.msra.mxu1 %v1708_v43  ;;  %v856_v43 = vld [vmem:[#allocation7 + $0x298] sm:$0xff]  ;;  %v874_v31 = vld [vmem:[#allocation7 + $0x328] sm:$0xff]  ;;  %v468_v52 = vrot.slane %v2363_v30, %v467_v38  ;;  %v851_v8 = vld [vmem:[#allocation7 + $0x270] sm:$0xff] }
  0xa9   : > { %1711 = vmatprep.subr.bf16.mxu1 %v1710_v44  ;;  %1701 = vmatpush3.bf16.msra.mxu0 %v1700_v4  ;;  %v1738_v48 = vpack.c.bf16 %v856_v43, %v855_v42  ;;  %v459_v4 = vsub.s32 5, %v2357_v28  ;;  %v848_v42 = vld [vmem:[#allocation7 + $0x258] sm:$0xff]  ;;  %v879_v13 = vld [vmem:[#allocation7 + $0x350] sm:$0xff]  ;;  %v1190_v38 = vld [vmem:[#allocation8 + $0x8] sm:$0xff] }
  0xaa   : > { %1735 = vmatprep.subr.bf16.mxu0 %v1734_v15  ;;  %v861_v15 = vld [vmem:[#allocation7 + $0x2c0] sm:$0xff]  ;;  %v880_v14 = vld [vmem:[#allocation7 + $0x358] sm:$0xff] }
  0xac   : > { %1713 = vmatpush3.bf16.msra.mxu1 %v1712_v49  ;;  %v839_v49 = vld [vmem:[#allocation7 + $0x210] sm:$0xff] }
  0xad   : > { %1715 = vmatprep.subr.bf16.mxu1 %v1714_v50  ;;  %v840_v50 = vld [vmem:[#allocation7 + $0x218] sm:$0xff] }
  0xb0   : > { %1717 = vmatpush3.bf16.msra.mxu1 %v1716_v54  ;;  %v1740_v54 = vpack.c.bf16 %v840_v50, %v839_v49  ;;  %v866_v49 = vld [vmem:[#allocation7 + $0x2e8] sm:$0xff]  ;;  %v893_v50 = vld [vmem:[#allocation7 + $0x3c0] sm:$0xff] }
  0xb1   : > { %1719 = vmatprep.subr.bf16.mxu1 %v1718_v55  ;;  %v841_v55 = vld [vmem:[#allocation7 + $0x220] sm:$0xff] }
  0xb2   : > { %v1744_v6 = vpack.c.bf16 %v842_v56, %v841_v55  ;;  %v849_v55 = vld [vmem:[#allocation7 + $0x260] sm:$0xff]  ;;  %v850_v56 = vld [vmem:[#allocation7 + $0x268] sm:$0xff] }
  0xb4   : > { %1721 = vmatpush3.bf16.msra.mxu1 %v1720_v58 }
  0xb5   : > { %1723 = vmatprep.subr.bf16.mxu1 %v1722_v3  ;;  %v888_v3 = vld [vmem:[#allocation7 + $0x398] sm:$0xff] }
  0xb6   : > { %v1770_v12 = vpack.c.bf16 %v888_v3, %v887_v2  ;;  %v895_v2 = vld [vmem:[#allocation7 + $0x3d0] sm:$0xff]  ;;  %v896_v3 = vld [vmem:[#allocation7 + $0x3d8] sm:$0xff] }
  0xb8   : > { %1725 = vmatpush3.bf16.msra.mxu1 %v1724_v7  ;;  %v1768_v7 = vpack.c.bf16 %v870_v61, %v869_v60  ;;  %v877_v60 = vld [vmem:[#allocation7 + $0x340] sm:$0xff]  ;;  %v878_v61 = vld [vmem:[#allocation7 + $0x348] sm:$0xff] }
  0xb9   : > { %1727 = vmatprep.subr.bf16.mxu1 %v1726_v11  ;;  %v1746_v11 = vpack.c.bf16 %v860_v1, %v859_v62  ;;  %v867_v62 = vld [vmem:[#allocation7 + $0x2f0] sm:$0xff]  ;;  %v868_v1 = vld [vmem:[#allocation7 + $0x2f8] sm:$0xff] }
  0xbc   : > { %1729 = vmatpush3.bf16.msra.mxu1 %v1728_v16  ;;  %v862_v16 = vld [vmem:[#allocation7 + $0x2c8] sm:$0xff] }
  0xbd   : > { %1731 = vmatprep.subr.bf16.mxu1 %v1730_v19  ;;  %v460_v19 = vrot.slane %v2363_v30, %v459_v4 }
  0xc0   : > { %1733 = vmatpush3.bf16.msra.mxu1 %v1732_v23  ;;  %v845_v23 = vld [vmem:[#allocation7 + $0x240] sm:$0xff] }
  0xc1   : > { %1767 = vmatprep.subr.bf16.mxu1 %v1766_v26  ;;  %v1750_v26 = vpack.c.bf16 %v862_v16, %v861_v15  ;;  %v1752_v39 = vpack.c.bf16 %v846_v24, %v845_v23  ;;  %v897_v15 = vld [vmem:[#allocation7 + $0x3e0] sm:$0xff]  ;;  %v898_v16 = vld [vmem:[#allocation7 + $0x3e8] sm:$0xff] }
  0xc2   : > { %v881_v23 = vld [vmem:[#allocation7 + $0x360] sm:$0xff]  ;;  %v882_v24 = vld [vmem:[#allocation7 + $0x368] sm:$0xff] }
 0x15e   : > { %v547_v34 = vpop.f32.mrb[0].mxu1 }
 0x15f   : > { %v548_v35 = vadd.f32 %v547_v34, %v440_v32  ;;  %v549_v36 = vpop.f32.mrb[1].mxu1  ;;  %v863_v32 = vld [vmem:[#allocation7 + $0x2d0] sm:$0xff]  ;;  %v864_v34 = vld [vmem:[#allocation7 + $0x2d8] sm:$0xff] }
 0x160   : > { %v550_v40 = vadd.f32 %v549_v36, %v444_v33  ;;  %v892_v36 = vld [vmem:[#allocation7 + $0x3b8] sm:$0xff] }
 0x161   : > { %v765_v44 = vmax.f32 %v548_v35, 0.0  ;;  %v891_v35 = vld [vmem:[#allocation7 + $0x3b0] sm:$0xff] }
 0x162   : > { %v766_v45 = vmax.f32 %v550_v40, 0.0  ;;  %v1776_v40 = vpack.c.bf16 %v874_v31, %v873_v29  ;;  %v1792_v31 = vpack.c.bf16 %v882_v24, %v881_v23 }
 0x164   : > { %972 = vmatprep.mubr.f32.mxu0 %v766_v45  ;;  %v1778_v45 = vpack.c.bf16 %v892_v36, %v891_v35 }
 0x165   : > { %973 = vmatmul.mubr.f32.vlgmr.msra.gmra.mrb[0].mxu0 %v765_v44  ;;  %v1754_v44 = vpack.c.bf16 %v864_v34, %v863_v32  ;;  %v884_v34 = vld [vmem:[#allocation7 + $0x378] sm:$0xff] }
 0x166   : > { %1737 = vmatpush3.bf16.msra.mxu0 %v1736_v46  ;;  %v618_v20 = vpop.f32.mrb[2].mxu1  ;;  %v875_v46 = vld [vmem:[#allocation7 + $0x330] sm:$0xff] }
 0x167   : > { %v619_v57 = vadd.f32 %v618_v20, %v448_v47  ;;  %v620_v58 = vpop.f32.mrb[3].mxu1  ;;  %1739 = vmatprep.subr.bf16.mxu0 %v1738_v48  ;;  %v876_v47 = vld [vmem:[#allocation7 + $0x338] sm:$0xff]  ;;  %v865_v48 = vld [vmem:[#allocation7 + $0x2e0] sm:$0xff]  ;;  %v1756_v20 = vpack.c.bf16 %v848_v42, %v847_v41 }
 0x168   : > { %v621_v63 = vadd.f32 %v620_v58, %v452_v51  ;;  %v894_v51 = vld [vmem:[#allocation7 + $0x3c8] sm:$0xff]  ;;  %v1758_v58 = vpack.c.bf16 %v866_v49, %v865_v48  ;;  %v1192_v42 = vld [vmem:[#allocation8 + $0x18] sm:$0xff]  ;;  %v1197_v49 = vld [vmem:[#allocation8 + $0x40] sm:$0xff] }
 0x169   : > { %v767_v10 = vmax.f32 %v619_v57, 0.0 }
 0x16a   : > { %v768_v5 = vmax.f32 %v621_v63, 0.0  ;;  %1741 = vmatpush3.bf16.msra.mxu0 %v1740_v54  ;;  %v1780_v54 = vpack.c.bf16 %v876_v47, %v875_v46  ;;  %v1195_v46 = vld [vmem:[#allocation8 + $0x30] sm:$0xff]  ;;  %v1196_v47 = vld [vmem:[#allocation8 + $0x38] sm:$0xff] }
 0x16b   : > { %1743 = vmatprep.subr.bf16.mxu0 %v1742_v59  ;;  %v1782_v59 = vpack.c.bf16 %v894_v51, %v893_v50  ;;  %v1808_v48 = vpack.c.bf16 %v1196_v47, %v1195_v46  ;;  %v1198_v50 = vld [vmem:[#allocation8 + $0x48] sm:$0xff] }
 0x16c   : > { %1042 = vmatprep.mubr.f32.mxu1 %v768_v5  ;;  %v456_v5 = vrot.slane %v2363_v30, %v455_v53  ;;  %v1811_v51 = vpack.c.bf16 %v1198_v50, %v1197_v49  ;;  %v1200_v53 = vld [vmem:[#allocation8 + $0x58] sm:$0xff] }
 0x16d   : > { %1043 = vmatmul.mubr.f32.vlgmr.msra.gmra.mrb[8].mxu1 %v767_v10  ;;  %v1762_v10 = vpack.c.bf16 %v868_v1, %v867_v62 }
 0x16e   : > { %1745 = vmatpush3.bf16.msra.mxu0 %v1744_v6  ;;  %1769 = vmatpush3.bf16.msra.mxu1 %v1768_v7  ;;  %v2374_v25 = vpop.f32.mrb[4].mxu1  ;;  %v1760_v6 = vpack.c.bf16 %v850_v56, %v849_v55  ;;  %v1784_v7 = vpack.c.bf16 %v878_v61, %v877_v60  ;;  %v1202_v55 = vld [vmem:[#allocation8 + $0x68] sm:$0xff]  ;;  %v2110_v60 = vmov 0  }
 0x16f   : > { %1747 = vmatprep.subr.bf16.mxu0 %v1746_v11  ;;  %1771 = vmatprep.subr.bf16.mxu1 %v1770_v12  ;;  %v691_v33 = vpop.f32.mrb[5].mxu1  ;;  %v1786_v11 = vpack.c.bf16 %v896_v3, %v895_v2  ;;  %v852_v12 = vld [vmem:[#allocation7 + $0x278] sm:$0xff]  ;;  %v690_v17 = vadd.f32 %v2374_v25, %v456_v5  ;;  %v1282_v61 = vld [vmem:[%s397_s17] sm:$0xff] }
 0x170   : > { %v692_v37 = vadd.f32 %v691_v33, %v460_v19  ;;  %v1764_v18 = vpack.c.bf16 %v852_v12, %v851_v8  ;;  %v1788_v19 = vpack.c.bf16 %v880_v14, %v879_v13  ;;  %v883_v33 = vld [vmem:[#allocation7 + $0x370] sm:$0xff]  ;;  %1910 = vset.pattern.permute.xlu0 %v2110_v60  ;;  %v1439_v2 = vld [vmem:[%s2448_s6] ss:$0 sm:$0xff] }
 0x171   : > { %v769_v29 = vmax.f32 %v690_v17, 0.0  ;;  %v1796_v35 = vpack.c.bf16 %v884_v34, %v883_v33  ;;  %1289 = vperm.xlu0 %1910, %v1282_v61  }
 0x172   : > { %1749 = vmatpush3.bf16.msra.mxu0 %v1748_v21  ;;  %1773 = vmatpush3.bf16.msra.mxu1 %v1772_v22  ;;  %v770_v43 = vmax.f32 %v692_v37, 0.0  ;;  %v463_v21 = vsub.s32 6, %v2357_v28  ;;  %v1790_v22 = vpack.c.bf16 %v898_v16, %v897_v15  ;;  %v1189_v37 = vld [vmem:[#allocation8] sm:$0xff]  ;;  %v1441_v16 = vld [vmem:[#allocation2] ss:$0 sm:$0xff] }
 0x173   : > { %1751 = vmatprep.subr.bf16.mxu0 %v1750_v26  ;;  %1775 = vmatprep.subr.bf16.mxu1 %v1774_v27  ;;  %v899_v26 = vld [vmem:[#allocation7 + $0x3f0] sm:$0xff]  ;;  %v900_v27 = vld [vmem:[#allocation7 + $0x3f8] sm:$0xff]  ;;  %v1799_v41 = vpack.c.bf16 %v1190_v38, %v1189_v37 }
 0x174   : > { %1112 = vmatprep.mubr.f32.mxu0 %v770_v43  ;;  %v464_v32 = vrot.slane %v2363_v30, %v463_v21  ;;  %v1794_v25 = vpack.c.bf16 %v900_v27, %v899_v26  ;;  %v1193_v43 = vld [vmem:[#allocation8 + $0x20] sm:$0xff] }
 0x176   : > { %1753 = vmatpush3.bf16.msra.mxu0 %v1752_v39  ;;  %1777 = vmatpush3.bf16.msra.mxu1 %v1776_v40  ;;  %v760_v57 = vpop.f32.mrb[6].mxu1  ;;  %v1191_v39 = vld [vmem:[#allocation8 + $0x10] sm:$0xff]  ;;  %v2108_v40 = vmov 0.0|0.0  }
 0x177   : > { %1755 = vmatprep.subr.bf16.mxu0 %v1754_v44  ;;  %1779 = vmatprep.subr.bf16.mxu1 %v1778_v45  ;;  %v762_v63 = vpop.f32.mrb[7].mxu1  ;;  %v761_v36 = vadd.f32 %v760_v57, %v464_v32  ;;  %v1802_v30 = vpack.c.bf16 %v1192_v42, %v1191_v39  ;;  %v1194_v44 = vld [vmem:[#allocation8 + $0x28] sm:$0xff]  ;;  %v1203_v57 = vld [vmem:[#allocation8 + $0x70] sm:$0xff] }
 0x178   : > { %v763_v4 = vadd.f32 %v762_v63, %v468_v52  ;;  %v1805_v45 = vpack.c.bf16 %v1194_v44, %v1193_v43  ;;  %v1199_v52 = vld [vmem:[#allocation8 + $0x50] sm:$0xff] }
 0x179   : > { %v771_v28 = vmax.f32 %v761_v36, 0.0 }
 0x17a   : > { %1757 = vmatpush3.bf16.msra.mxu0 %v1756_v20  ;;  %1781 = vmatpush3.bf16.msra.mxu1 %v1780_v54  ;;  %v772_v9 = vmax.f32 %v763_v4, 0.0  ;;  %v1814_v20 = vpack.c.bf16 %v1200_v53, %v1199_v52  ;;  %v1201_v54 = vld [vmem:[#allocation8 + $0x60] sm:$0xff] }
 0x17b   : > { %1759 = vmatprep.subr.bf16.mxu0 %v1758_v58  ;;  %1783 = vmatprep.subr.bf16.mxu1 %v1782_v59  ;;  %v1817_v56 = vpack.c.bf16 %v1202_v55, %v1201_v54  ;;  %v1204_v58 = vld [vmem:[#allocation8 + $0x78] sm:$0xff] }
 0x17c   : > { %1182 = vmatprep.mubr.f32.mxu1 %v772_v9  ;;  %v1820_v59 = vpack.c.bf16 %v1204_v58, %v1203_v57 }
 0x17e   : > { %1761 = vmatpush3.bf16.msra.mxu0 %v1760_v6  ;;  %1785 = vmatpush3.bf16.msra.mxu1 %v1784_v7 }
 0x17f   : > { %1763 = vmatprep.subr.bf16.mxu0 %v1762_v10  ;;  %1787 = vmatprep.subr.bf16.mxu1 %v1786_v11 }
 0x182   : > { %1765 = vmatpush3.bf16.msra.mxu0 %v1764_v18  ;;  %1789 = vmatpush3.bf16.msra.mxu1 %v1788_v19  ;;  %v1440_v18 = vld [vmem:[%s2450_s8] ss:$0 sm:$0xff] }
 0x183   : > { %1791 = vmatprep.subr.bf16.mxu1 %v1790_v22  ;;  %1798 = vmatprep.subr.bf16.mxu0 %v2108_v40 }
 0x185   : > { %1113 = vmatmul.mubr.f32.vlgmr.msra.gmra.mrb[2].mxu0 %v769_v29 }
 0x186   : > { %1793 = vmatpush3.bf16.msra.mxu1 %v1792_v31  ;;  %1800 = vmatpush3.bf16.msra.mxu0 %v1799_v41 }
 0x187   : > { %1795 = vmatprep.subr.bf16.mxu1 %v1794_v25  ;;  %1801 = vmatprep.subr.bf16.mxu0 %v2108_v40 }
 0x188   : > { %1635 = vmatprep.mubr.msk.f32.mxu0 %vm2109_vm1, %v2107_v0 }
 0x18a   : > { %1797 = vmatpush3.bf16.msra.mxu1 %v1796_v35  ;;  %1803 = vmatpush3.bf16.msra.mxu0 %v1802_v30 }
 0x18b   : > { %1804 = vmatprep.subr.bf16.mxu0 %v2108_v40 }
 0x18d   : > { %1183 = vmatmul.mubr.f32.vlgmr.msra.gmra.mrb[10].mxu1 %v771_v28 }
 0x18e   : > { %1806 = vmatpush3.bf16.msra.mxu0 %v1805_v45 }
 0x18f   : > { %1807 = vmatprep.subr.bf16.mxu0 %v2108_v40 }
 0x192   : > { %1809 = vmatpush3.bf16.msra.mxu0 %v1808_v48 }
 0x193   : > { %1810 = vmatprep.subr.bf16.mxu0 %v2108_v40 }
 0x196   : > { %1812 = vmatpush3.bf16.msra.mxu0 %v1811_v51 }
 0x197   : > { %1813 = vmatprep.subr.bf16.mxu0 %v2108_v40 }
 0x19a   : > { %1815 = vmatpush3.bf16.msra.mxu0 %v1814_v20 }
 0x19b   : > { %1816 = vmatprep.subr.bf16.mxu0 %v2108_v40 }
 0x19e   : > { %1818 = vmatpush3.bf16.msra.mxu0 %v1817_v56 }
 0x19f   : > { %1819 = vmatprep.subr.bf16.mxu0 %v2108_v40 }
 0x1a2   : > { %1821 = vmatpush3.bf16.msra.mxu0 %v1820_v59 }
 0x1f0   : > { %v1290_v17 = vpop.permute.xlu0 %1289 }
 0x1f1   : > { %vm1291_vm2 = vcmp.eq.s32.totalorder %v1441_v16, %v1290_v17 }
 0x238   : > { %v1478_v62 = vpop.f32.mrb[0].mxu0 }
 0x239   : > { %v1479_v63 = vpop.f32.mrb[1].mxu0 }
 0x23a   : > { %v1480_v1 = vadd.f32 %v1479_v63, %v1478_v62 }
 0x23c   : > { %v975_v0 = vadd.f32 %v1480_v1, %v1439_v2 }
 0x240   : > { %v1513_v3 = vpop.f32.mrb[8].mxu1 }
 0x241   : > { %v1514_v4 = vpop.f32.mrb[9].mxu1 }
 0x242   : > { %v1515_v5 = vadd.f32 %v1514_v4, %v1513_v3 }
 0x244   : > { %v1045_v6 = vadd.f32 %v1515_v5, %v975_v0 }
 0x258   : > { %v1548_v7 = vpop.f32.mrb[2].mxu0 }
 0x259   : > { %v1549_v8 = vpop.f32.mrb[3].mxu0 }
 0x25a   : > { %v1550_v9 = vadd.f32 %v1549_v8, %v1548_v7 }
 0x25c   : > { %v1115_v10 = vadd.f32 %v1550_v9, %v1045_v6 }
 0x260   : > { %v1583_v11 = vpop.f32.mrb[10].mxu1 }
 0x261   : > { %v1584_v12 = vpop.f32.mrb[11].mxu1 }
 0x262   : > { %v1585_v13 = vadd.f32 %v1584_v12, %v1583_v11 }
 0x264   : > { %v1185_v14 = vadd.f32 %v1585_v13, %v1115_v10 }
 0x266   : > { %v1188_v15 = vmax.f32 %v1185_v14, 0.0 }
 0x268   : > { %1636 = vmatmul.mubr.f32.vlgmr.msra.gmra.mrb[4].mxu0 %v1188_v15 }
 0x33b   : > { %v1278_v19 = vpop.f32.mrb[4].mxu0 }
 0x33c   : > { %v1279_v21 = vadd.f32 %v1440_v18, %v1278_v19  ;;  %v1637_v22 = vpop.f32.mrb[5].mxu0 }
 0x33e   : > { %v1292_v23 = vsel %vm1291_vm2, %v1279_v21, -inf }
 0x33f   : > { %1293 = vst [vmem:[%s393_s18] sm:$0xff] %v1292_v23 }
 0x340   : > { %2036 = shalt.err (!%p2033_p10)
}
 0x341   : > { %s2037_s17 = scalar_lea.hbm %s2400_s23, 128  ;;  %s2041_s27 = scalar_lea.hbm %s2451_s9, 384 }
 0x342   : > { %p2038_p0 = scmp.ne.s32.totalorder %s2400_s23, %s2037_s17  ;;  %p2042_p4 = scmp.lt.u32.totalorder %s2400_s23, %s2451_s9 }
 0x343   : > { %p2043_p12 = scmp.lt.u32.totalorder %s2041_s27, %s2037_s17  ;;  %p2045_p8 = scmp.lt.u32.totalorder %s2037_s17, %s2400_s23 }
 0x344   : > { %p2039_p2 = pnand %p2038_p0, %p2477_p11 }
 0x345   : > { %p2044_p7 = por %p2043_p12, %p2042_p4 }
 0x346   : > { %p2040_p3 = pneg %p2039_p2 }
 0x347   : > { %p2046_p13 = por %p2045_p8, %p2044_p7 }
 0x349   : > { %p2047_p1 = pnand %p2046_p13, %p2040_p3 }
 0x34b   : > { %2050 = shalt.err (!%p2047_p1)
}
 0x34c   : > { %1838 = dma.vmem_to_hbm [thread:$0]  (%p2477_p11), %s2402_s21, 128, %s2400_s23, %s1295_s11  }
 0x34d PF: > { %s2478_s15 = sld [smem:[#allocation15_spill]]  ;;  %s2479_s30 = sld [smem:[#allocation19_spill]] }
 0x34e   : > { %p1865_p6 = scmp.ge.s32.totalorder %s2097_s12, 2 }
 0x353   : > { %s1320_s18 = sand.u32 1, %s2478_s15   ;;  %p2480_p9 = scmp.ne.s32.totalorder %s2479_s30, 0 }
 0x354   : > { %s1321_s24 = scalar_lea.sflag [#allocation4], %s1320_s18 }
 0x355   : > { %p1854_p5 = pnand %p1865_p6, %p2480_p9 }
 0x357   : > { %2080 = dma.done.wait (!%p1854_p5), %s1321_s24, 128  }
 0x358   : > { %2082 = vsyncadd (!%p1854_p5), %s1321_s24, 4294967168  ;;  %s2481_s12 = sld [smem:[#allocation17_spill]]  ;;  %s2482_s26 = sld [smem:[#allocation16_spill]] }
 0x359   : > { %s2483_s11 = sld [smem:[#allocation18_spill]]  ;;  %s2484_s30 = smov %s2089_s10 }
 0x35e   : > { %p22_p10 = scmp.ge.s32.totalorder %s2481_s12, 5   ;;  %s2485_s10 = smov %s2482_s26 }
 0x360   :  { %24 = sbr.rel (!%p22_p10) target bundleno = 6 (0x6), region = 111 }
 0x367   :  { %1326 = vsyncpa [#allocation3], 1 }
 0x368   :  { %1328 = vsyncpa [#allocation3 + $0x1], 1 }
 0x369   :  { %1329 = vsyncpa [#allocation6], 1 }
 0x36a   :  { %1330 = vsyncpa [#allocation9], 1 }
 0x36b   :  { %1331 = vsyncpa [#allocation4], 1 }
 0x36c   :  { %1333 = vsyncpa [#allocation4 + $0x1], 1 }

</bundles_post_ra>
